<compile_context>
chip_gen: v5e
topology: v5e:2x2
jax: 0.10.0
libtpu: 0.0.40
codegen_flags: <defaults>
</compile_context>

<pallas_src>
import functools
import math

import jax
import jax.numpy as jnp
from jax.experimental import pallas as pl
from jax.experimental.pallas import tpu as pltpu

LN_EPS = 1e-5
_INV_SQRT2 = 1.0 / math.sqrt(2.0)


def _round_up(x, m):
    return ((x + m - 1) // m) * m


def _policy_kernel(x_ref, w1_ref, b1_ref, g_ref, beta_ref, w2_ref, b2_ref,
                   logits_ref, probs_ref, *, inv_temp):
    # x_ref: (tm, H)   w1: (H, H)   b1/g/beta: (1, H)   w2: (H, A)   b2: (1, A)
    x = x_ref[...].astype(jnp.float32)

    # Linear 1 (MXU) + bias
    h = jnp.dot(x, w1_ref[...], preferred_element_type=jnp.float32) + b1_ref[...]

    # LayerNorm over the hidden dim
    mu = jnp.mean(h, axis=-1, keepdims=True)
    var = jnp.mean((h - mu) ** 2, axis=-1, keepdims=True)
    hn = (h - mu) * jax.lax.rsqrt(var + LN_EPS)
    hn = hn * g_ref[...] + beta_ref[...]

    # Exact (erf-based) GELU, matching torch.nn.GELU() default
    a = 0.5 * hn * (1.0 + jax.lax.erf(hn * _INV_SQRT2))

    # Dropout is identity in eval mode.

    # Linear 2 -> action logits (full-width MXU matmul, lane-dense output)
    logits = jnp.dot(a, w2_ref[...], preferred_element_type=jnp.float32) + b2_ref[...]
    logits_ref[...] = logits.astype(logits_ref.dtype)

    # Softmax over the action dim with temperature
    z = logits * inv_temp
    z = z - jnp.max(z, axis=-1, keepdims=True)
    e = jnp.exp(z)
    probs_ref[...] = (e / jnp.sum(e, axis=-1, keepdims=True)).astype(probs_ref.dtype)


def policy_network_forward(hidden_states, params, *, policy_temperature=1.0, tm=256):
    """hidden_states: [B, S, H] -> {'action_logits': [B,S,A], 'action_probs': [B,S,A]}."""
    B, S, H = hidden_states.shape
    A = params["w2"].shape[1]
    assert H % 128 == 0 and A % 128 == 0, "hidden/action dims must be lane aligned"
    M = B * S

    x = hidden_states.reshape(M, H).astype(jnp.float32)

    # Choose the row tile: multiple of 8, as large as allowed, but split into
    # >= 2 grid steps when possible so both v7x TensorCores see work.
    rows8 = _round_up(M, 8)
    tm_eff = min(tm, rows8)
    if tm_eff >= rows8 and rows8 >= 16:
        tm_eff = _round_up(rows8 // 2, 8)
    Mp = _round_up(M, tm_eff)
    if Mp != M:
        x = jnp.pad(x, ((0, Mp - M), (0, 0)))

    w1 = params["w1"]                   # (H, H)
    b1 = params["b1"].reshape(1, H)
    gamma = params["gamma"].reshape(1, H)
    beta = params["beta"].reshape(1, H)
    w2 = params["w2"]                   # (H, A)
    b2 = params["b2"].reshape(1, A)

    grid = (Mp // tm_eff,)

    cost = pl.CostEstimate(
        flops=2 * Mp * H * (H + A),
        transcendentals=Mp * (H + A),           # erf + exp
        bytes_accessed=4 * (Mp * H + H * H + H * A + 4 * H + A + 2 * Mp * A),
    )

    kernel = functools.partial(_policy_kernel,
                               inv_temp=float(1.0 / policy_temperature))

    logits, probs = pl.pallas_call(
        kernel,
        out_shape=(jax.ShapeDtypeStruct((Mp, A), jnp.float32),
                   jax.ShapeDtypeStruct((Mp, A), jnp.float32)),
        grid_spec=pltpu.PrefetchScalarGridSpec(
            num_scalar_prefetch=0,
            grid=grid,
            in_specs=[
                pl.BlockSpec((tm_eff, H), lambda i: (i, 0)),   # x rows tile
                pl.BlockSpec((H, H), lambda i: (0, 0)),        # w1 (resident)
                pl.BlockSpec((1, H), lambda i: (0, 0)),        # b1
                pl.BlockSpec((1, H), lambda i: (0, 0)),        # gamma
                pl.BlockSpec((1, H), lambda i: (0, 0)),        # beta
                pl.BlockSpec((H, A), lambda i: (0, 0)),        # w2 (resident)
                pl.BlockSpec((1, A), lambda i: (0, 0)),        # b2
            ],
            out_specs=[
                pl.BlockSpec((tm_eff, A), lambda i: (i, 0)),   # logits (lane-dense)
                pl.BlockSpec((tm_eff, A), lambda i: (i, 0)),   # probs  (lane-dense)
            ],
        ),
        compiler_params=pltpu.CompilerParams(
            dimension_semantics=("parallel",),
            vmem_limit_bytes=32 * 1024 * 1024,
        ),
        cost_estimate=cost,
    )(x, w1, b1, gamma, beta, w2, b2)

    logits = logits[:M].reshape(B, S, A)
    probs = probs[:M].reshape(B, S, A)
    return {"action_logits": logits, "action_probs": probs}


def init_params(key, hidden_size, action_space_size):
    """Deterministic synthetic parameters matching the PyTorch module shapes."""
    k1, k2, k3, k4 = jax.random.split(key, 4)
    H, A = hidden_size, action_space_size
    s1 = 1.0 / math.sqrt(H)
    return {
        "w1": jax.random.uniform(k1, (H, H), jnp.float32, -s1, s1),
        "b1": jax.random.uniform(k2, (H,), jnp.float32, -s1, s1),
        "gamma": jnp.ones((H,), jnp.float32),
        "beta": jnp.zeros((H,), jnp.float32),
        "w2": jax.random.uniform(k3, (H, A), jnp.float32, -s1, s1),
        "b2": jax.random.uniform(k4, (A,), jnp.float32, -s1, s1),
    }


def _reference(hidden_states, params, policy_temperature=1.0):
    """Pure-JAX reference for sanity checking."""
    x = hidden_states.astype(jnp.float32)
    h = x @ params["w1"] + params["b1"]
    mu = jnp.mean(h, axis=-1, keepdims=True)
    var = jnp.mean((h - mu) ** 2, axis=-1, keepdims=True)
    hn = (h - mu) / jnp.sqrt(var + LN_EPS)
    hn = hn * params["gamma"] + params["beta"]
    a = 0.5 * hn * (1.0 + jax.lax.erf(hn * _INV_SQRT2))
    logits = a @ params["w2"] + params["b2"]
    probs = jax.nn.softmax(logits / policy_temperature, axis=-1)
    return logits, probs


if __name__ == "__main__":
    # Small shapes consistent with the module: [batch, seq, hidden], action dim 128.
    B, S, H, A = 2, 8, 256, 128
    key = jax.random.PRNGKey(0)
    kx, kp = jax.random.split(key)

    hidden_states = jax.random.normal(kx, (B, S, H), jnp.float32)
    params = init_params(kp, H, A)

    out = policy_network_forward(hidden_states, params, policy_temperature=1.0)
    logits = jax.block_until_ready(out["action_logits"])
    probs = out["action_probs"]

    ref_logits, ref_probs = _reference(hidden_states, params, 1.0)
    assert logits.shape == (B, S, A) and probs.shape == (B, S, A)
    assert jnp.allclose(logits, ref_logits, atol=1e-4, rtol=1e-4)
    assert jnp.allclose(probs, ref_probs, atol=1e-4, rtol=1e-4)
    assert jnp.allclose(jnp.sum(probs, axis=-1), 1.0, atol=1e-4)

    print("KERNEL_OK")
</pallas_src>

<mosaic_0001>
module attributes {stable_mosaic.version = 11 : i64} {
  func.func @_policy_kernel(%arg0: i32, %arg1: memref<8x256xf32, #tpu.memory_space<vmem>>, %arg2: memref<256x256xf32, #tpu.memory_space<vmem>>, %arg3: memref<1x256xf32, #tpu.memory_space<vmem>>, %arg4: memref<1x256xf32, #tpu.memory_space<vmem>>, %arg5: memref<1x256xf32, #tpu.memory_space<vmem>>, %arg6: memref<256x128xf32, #tpu.memory_space<vmem>>, %arg7: memref<1x128xf32, #tpu.memory_space<vmem>>, %arg8: memref<8x128xf32, #tpu.memory_space<vmem>>, %arg9: memref<8x128xf32, #tpu.memory_space<vmem>>) attributes {dimension_semantics = [#tpu.dimension_semantics<parallel>], iteration_bounds = array<i64: 2>, scalar_prefetch = 0 : i64, scratch_operands = 0 : i64, tpu.core_type = #tpu.core_type<tc>, window_params = [{transform_indices = @transform_0, window_bounds = array<i64: 8, 256>}, {pipeline_mode = #tpu.pipeline_mode<synchronous>, transform_indices = @transform_1, window_bounds = array<i64: 256, 256>}, {pipeline_mode = #tpu.pipeline_mode<synchronous>, transform_indices = @transform_2, window_bounds = array<i64: 1, 256>}, {pipeline_mode = #tpu.pipeline_mode<synchronous>, transform_indices = @transform_3, window_bounds = array<i64: 1, 256>}, {pipeline_mode = #tpu.pipeline_mode<synchronous>, transform_indices = @transform_4, window_bounds = array<i64: 1, 256>}, {pipeline_mode = #tpu.pipeline_mode<synchronous>, transform_indices = @transform_5, window_bounds = array<i64: 256, 128>}, {pipeline_mode = #tpu.pipeline_mode<synchronous>, transform_indices = @transform_6, window_bounds = array<i64: 1, 128>}, {transform_indices = @transform_7, window_bounds = array<i64: 8, 128>}, {transform_indices = @transform_8, window_bounds = array<i64: 8, 128>}]} {
    %c0 = arith.constant 0 : index
    %c0_0 = arith.constant 0 : index
    %0 = vector.load %arg1[%c0, %c0_0] : memref<8x256xf32, #tpu.memory_space<vmem>>, vector<8x256xf32>
    %c0_1 = arith.constant 0 : index
    %c0_2 = arith.constant 0 : index
    %1 = vector.load %arg2[%c0_1, %c0_2] : memref<256x256xf32, #tpu.memory_space<vmem>>, vector<256x256xf32>
    %cst = arith.constant dense<0.000000e+00> : vector<8x256xf32>
    %2 = tpu.matmul %0, %1, %cst {dimension_numbers = #tpu.dot_dimension_numbers<[1], [0], [0], [1], [0, 0, 1, 1], [], []>} : vector<8x256xf32>, vector<256x256xf32>, vector<8x256xf32> -> vector<8x256xf32>
    %c0_3 = arith.constant 0 : index
    %c0_4 = arith.constant 0 : index
    %3 = vector.load %arg3[%c0_3, %c0_4] : memref<1x256xf32, #tpu.memory_space<vmem>>, vector<1x256xf32>
    %4 = vector.broadcast %3 : vector<1x256xf32> to vector<8x256xf32>
    %5 = arith.addf %2, %4 : vector<8x256xf32>
    %cst_5 = arith.constant dense<0.000000e+00> : vector<8xf32>
    %6 = vector.multi_reduction <add>, %5, %cst_5 [1] : vector<8x256xf32> to vector<8xf32>
    %7 = vector.shape_cast %6 : vector<8xf32> to vector<8x1xf32>
    %cst_6 = arith.constant 2.560000e+02 : f32
    %8 = vector.broadcast %cst_6 : f32 to vector<8x1xf32>
    %9 = arith.divf %7, %8 : vector<8x1xf32>
    %10 = vector.broadcast %9 : vector<8x1xf32> to vector<8x256xf32>
    %11 = arith.subf %5, %10 : vector<8x256xf32>
    %12 = arith.mulf %11, %11 : vector<8x256xf32>
    %cst_7 = arith.constant dense<0.000000e+00> : vector<8xf32>
    %13 = vector.multi_reduction <add>, %12, %cst_7 [1] : vector<8x256xf32> to vector<8xf32>
    %14 = vector.shape_cast %13 : vector<8xf32> to vector<8x1xf32>
    %cst_8 = arith.constant 2.560000e+02 : f32
    %15 = vector.broadcast %cst_8 : f32 to vector<8x1xf32>
    %16 = arith.divf %14, %15 : vector<8x1xf32>
    %17 = vector.broadcast %9 : vector<8x1xf32> to vector<8x256xf32>
    %18 = arith.subf %5, %17 : vector<8x256xf32>
    %cst_9 = arith.constant 9.99999974E-6 : f32
    %19 = vector.broadcast %cst_9 : f32 to vector<8x1xf32>
    %20 = arith.addf %16, %19 : vector<8x1xf32>
    %21 = math.rsqrt %20 : vector<8x1xf32>
    %22 = vector.broadcast %21 : vector<8x1xf32> to vector<8x256xf32>
    %23 = arith.mulf %18, %22 : vector<8x256xf32>
    %c0_10 = arith.constant 0 : index
    %c0_11 = arith.constant 0 : index
    %24 = vector.load %arg4[%c0_10, %c0_11] : memref<1x256xf32, #tpu.memory_space<vmem>>, vector<1x256xf32>
    %25 = vector.broadcast %24 : vector<1x256xf32> to vector<8x256xf32>
    %26 = arith.mulf %23, %25 : vector<8x256xf32>
    %c0_12 = arith.constant 0 : index
    %c0_13 = arith.constant 0 : index
    %27 = vector.load %arg5[%c0_12, %c0_13] : memref<1x256xf32, #tpu.memory_space<vmem>>, vector<1x256xf32>
    %28 = vector.broadcast %27 : vector<1x256xf32> to vector<8x256xf32>
    %29 = arith.addf %26, %28 : vector<8x256xf32>
    %cst_14 = arith.constant 5.000000e-01 : f32
    %30 = vector.broadcast %cst_14 : f32 to vector<8x256xf32>
    %31 = arith.mulf %30, %29 : vector<8x256xf32>
    %cst_15 = arith.constant 0.707106769 : f32
    %32 = vector.broadcast %cst_15 : f32 to vector<8x256xf32>
    %33 = arith.mulf %29, %32 : vector<8x256xf32>
    %34 = math.erf %33 : vector<8x256xf32>
    %cst_16 = arith.constant 1.000000e+00 : f32
    %35 = vector.broadcast %cst_16 : f32 to vector<8x256xf32>
    %36 = arith.addf %35, %34 : vector<8x256xf32>
    %37 = arith.mulf %31, %36 : vector<8x256xf32>
    %c0_17 = arith.constant 0 : index
    %c0_18 = arith.constant 0 : index
    %38 = vector.load %arg6[%c0_17, %c0_18] : memref<256x128xf32, #tpu.memory_space<vmem>>, vector<256x128xf32>
    %cst_19 = arith.constant dense<0.000000e+00> : vector<8x128xf32>
    %39 = tpu.matmul %37, %38, %cst_19 {dimension_numbers = #tpu.dot_dimension_numbers<[1], [0], [0], [1], [0, 0, 1, 1], [], []>} : vector<8x256xf32>, vector<256x128xf32>, vector<8x128xf32> -> vector<8x128xf32>
    %c0_20 = arith.constant 0 : index
    %c0_21 = arith.constant 0 : index
    %40 = vector.load %arg7[%c0_20, %c0_21] : memref<1x128xf32, #tpu.memory_space<vmem>>, vector<1x128xf32>
    %41 = vector.broadcast %40 : vector<1x128xf32> to vector<8x128xf32>
    %42 = arith.addf %39, %41 : vector<8x128xf32>
    %c0_22 = arith.constant 0 : index
    %c0_23 = arith.constant 0 : index
    %43 = vector.load %arg8[%c0_22, %c0_23] : memref<8x128xf32, #tpu.memory_space<vmem>>, vector<8x128xf32>
    tpu.vector_store %arg8[%c0_22, %c0_23], %42 {strides = array<i32>} : memref<8x128xf32, #tpu.memory_space<vmem>>, vector<8x128xf32>,
    %cst_24 = arith.constant 1.000000e+00 : f32
    %44 = vector.broadcast %cst_24 : f32 to vector<8x128xf32>
    %45 = arith.mulf %42, %44 : vector<8x128xf32>
    %cst_25 = arith.constant dense<0xFF800000> : vector<8xf32>
    %46 = vector.multi_reduction <maximumf>, %45, %cst_25 [1] : vector<8x128xf32> to vector<8xf32>
    %47 = vector.shape_cast %46 : vector<8xf32> to vector<8x1xf32>
    %48 = vector.broadcast %47 : vector<8x1xf32> to vector<8x128xf32>
    %49 = arith.subf %45, %48 : vector<8x128xf32>
    %50 = math.exp %49 : vector<8x128xf32>
    %cst_26 = arith.constant dense<0.000000e+00> : vector<8xf32>
    %51 = vector.multi_reduction <add>, %50, %cst_26 [1] : vector<8x128xf32> to vector<8xf32>
    %52 = vector.shape_cast %51 : vector<8xf32> to vector<8x1xf32>
    %53 = vector.broadcast %52 : vector<8x1xf32> to vector<8x128xf32>
    %54 = arith.divf %50, %53 : vector<8x128xf32>
    %c0_27 = arith.constant 0 : index
    %c0_28 = arith.constant 0 : index
    %55 = vector.load %arg9[%c0_27, %c0_28] : memref<8x128xf32, #tpu.memory_space<vmem>>, vector<8x128xf32>
    tpu.vector_store %arg9[%c0_27, %c0_28], %54 {strides = array<i32>} : memref<8x128xf32, #tpu.memory_space<vmem>>, vector<8x128xf32>,
    return
  }
  func.func @transform_0(%arg0: i32) -> (i32, i32) {
    %c0_i32 = arith.constant 0 : i32
    %c0_i32_0 = arith.constant 0 : i32
    return %arg0, %c0_i32 : i32, i32
  }
  func.func @transform_1(%arg0: i32) -> (i32, i32) {
    %c0_i32 = arith.constant 0 : i32
    %c0_i32_0 = arith.constant 0 : i32
    %c0_i32_1 = arith.constant 0 : i32
    return %c0_i32, %c0_i32_0 : i32, i32
  }
  func.func @transform_2(%arg0: i32) -> (i32, i32) {
    %c0_i32 = arith.constant 0 : i32
    %c0_i32_0 = arith.constant 0 : i32
    %c0_i32_1 = arith.constant 0 : i32
    return %c0_i32, %c0_i32_0 : i32, i32
  }
  func.func @transform_3(%arg0: i32) -> (i32, i32) {
    %c0_i32 = arith.constant 0 : i32
    %c0_i32_0 = arith.constant 0 : i32
    %c0_i32_1 = arith.constant 0 : i32
    return %c0_i32, %c0_i32_0 : i32, i32
  }
  func.func @transform_4(%arg0: i32) -> (i32, i32) {
    %c0_i32 = arith.constant 0 : i32
    %c0_i32_0 = arith.constant 0 : i32
    %c0_i32_1 = arith.constant 0 : i32
    return %c0_i32, %c0_i32_0 : i32, i32
  }
  func.func @transform_5(%arg0: i32) -> (i32, i32) {
    %c0_i32 = arith.constant 0 : i32
    %c0_i32_0 = arith.constant 0 : i32
    %c0_i32_1 = arith.constant 0 : i32
    return %c0_i32, %c0_i32_0 : i32, i32
  }
  func.func @transform_6(%arg0: i32) -> (i32, i32) {
    %c0_i32 = arith.constant 0 : i32
    %c0_i32_0 = arith.constant 0 : i32
    %c0_i32_1 = arith.constant 0 : i32
    return %c0_i32, %c0_i32_0 : i32, i32
  }
  func.func @transform_7(%arg0: i32) -> (i32, i32) {
    %c0_i32 = arith.constant 0 : i32
    %c0_i32_0 = arith.constant 0 : i32
    return %arg0, %c0_i32 : i32, i32
  }
  func.func @transform_8(%arg0: i32) -> (i32, i32) {
    %c0_i32 = arith.constant 0 : i32
    %c0_i32_0 = arith.constant 0 : i32
    return %arg0, %c0_i32 : i32, i32
  }
}

</mosaic_0001>

<bundles_post_ra>
// kernel: tpu_custom_call.1
= control target key start
LH: loop header
LB: loop body
LE: loop exit
PB: predicated region body
PF: predicated region fallthrough
CT: control target
= control target key end

     0   :  { %s1638_s0 = inlined_call_operand.hbm [shape: f32[16,256], index: 0, kind: input, shape index: {}]   ;;  %s1639_s1 = inlined_call_operand.hbm [shape: f32[256,256], index: 1, kind: input, shape index: {}]   ;;  %s1640_s2 = inlined_call_operand.hbm [shape: f32[1,256], index: 2, kind: input, shape index: {}]   ;;  %s1641_s3 = inlined_call_operand.vmem [shape: f32[1,256], index: 3, kind: input, shape index: {}]   ;;  %s1642_s4 = inlined_call_operand.hbm [shape: f32[1,256], index: 4, kind: input, shape index: {}]   ;;  %s1643_s5 = inlined_call_operand.hbm [shape: f32[256,128], index: 5, kind: input, shape index: {}]   ;;  %s1644_s6 = inlined_call_operand.vmem [shape: f32[1,128], index: 6, kind: input, shape index: {}]   ;;  %s1645_s7 = inlined_call_operand.hbm [shape: f32[16,128], index: 7, kind: output, shape index: {0}]   ;;  %s1646_s8 = inlined_call_operand.hbm [shape: f32[16,128], index: 8, kind: output, shape index: {1}]  }
   0x1   :  { %1648 = sst [smem:[#allocation19_spill]] %s1639_s1 }
   0x2   :  { %1649 = sst [smem:[#allocation20_spill]] %s1640_s2 }
   0x3   :  { %1650 = sst [smem:[#allocation21_spill]] %s1642_s4 }
   0x4   :  { %14 = vsyncpa [#allocation3], 0 }
   0x5   :  { %16 = vsyncpa [#allocation3 + $0x1], 0 }
   0x6   :  { %17 = vsyncpa [#allocation6], 0 }
   0x7   :  { %18 = vsyncpa [#allocation9], 0 }
   0x8   :  { %19 = vsyncpa [#allocation4], 0 }
   0x9   :  { %21 = vsyncpa [#allocation4 + $0x1], 0 }
   0xa   :  { %22 = vsyncpa [#allocation13], 0 }
   0xb   :  { %24 = vsyncpa [#allocation13 + $0x1], 0  ;;  %s1410_s27 = smov 0   ;;  %s1412_s28 = smov 0  }
   0xc   :  { %s1414_s29 = smov 0   ;;  %s1416_s30 = smov 0  }
   0xd LB: > { %s1651_s1 = sld [smem:[#allocation19_spill]]  ;;  %s1434_s12 = sadd.s32 4294967295, %s1354_s30   ;;  %s1354_s30 = sphi %s1416_s30, %s1666_s30   ;;  %s1350_s29 = sphi %s1414_s29, %s1665_s29   ;;  %s1346_s28 = sphi %s1412_s28, %s1664_s28   ;;  %s1342_s27 = sphi %s1410_s27, %s1663_s27  }
   0xe   : > { %p962_p0 = scmp.ge.s32.totalorder %s1354_s30, 1  ;;  %p51_p1 = scmp.eq.s32.totalorder %s1434_s12, 0 }
   0xf   : > { %p239_p2 = scmp.lt.s32.totalorder %s1354_s30, 3  ;;  %s1356_s14 = smov [#allocation5]  }
  0x10   : > { %s252_s15 = sshll.u32 %s1356_s14, 4  ;;  %s1653_s4 = sld [smem:[#allocation21_spill]]  ;;  %s253_s15 = int_to_ptr.vmem [resolvable:$true] %s252_s15 }
  0x11   : > { %p1439_p3 = pnand %p962_p0, %p239_p2  ;;  %s1655_s2 = sld [smem:[#allocation20_spill]] }
  0x12   : > { %s1357_s23 = smov [#allocation8]   ;;  %s1358_s25 = smov 256  }
  0x13   : > { %s250_s11 = sshll.u32 %s1651_s1, 4  ;;  %p1010_p4 = pneg %p1439_p3  ;;  %s251_s11 = int_to_ptr.hbm [resolvable:$true] %s250_s11 }
  0x14   : > { %s282_s24 = sshll.u32 %s1357_s23, 4  ;;  %s1359_s26 = smov 16   ;;  %s283_s24 = int_to_ptr.vmem [resolvable:$true] %s282_s24 }
  0x15   : > { %p1451_p6 = pnand %p1010_p4, %p51_p1  ;;  %s291_s14 = sshll.u32 %s1643_s5, 4  ;;  %s292_s14 = int_to_ptr.hbm [resolvable:$true] %s291_s14 }
  0x16   : > { %s280_s18 = sshll.u32 %s1653_s4, 4  ;;  %s1360_s16 = smov [#allocation7]   ;;  %s281_s18 = int_to_ptr.hbm [resolvable:$true] %s280_s18 }
  0x17   : > { %s265_s22 = sshll.u32 %s1655_s2, 4  ;;  %s267_s17 = sshll.u32 %s1360_s16, 4  ;;  %s266_s22 = int_to_ptr.hbm [resolvable:$true] %s265_s22  ;;  %s268_s17 = int_to_ptr.vmem [resolvable:$true] %s267_s17 }
  0x18   : > { %1013 = dma.hbm_to_vmem [thread:$0]  (!%p1451_p6), %s251_s11, 8192, %s253_s15, [#allocation6], %s1358_s25, %s1358_s25, %s1359_s26  }
  0x19   : > { %1019 = dma.hbm_to_vmem [thread:$0]  (!%p1451_p6), %s281_s18, 32, %s283_s24, [#allocation9]  }
  0x1a   : > { %1016 = dma.hbm_to_vmem [thread:$0]  (!%p1451_p6), %s266_s22, 32, %s268_s17, [#allocation6]  }
  0x1b   : > { %s1361_s11 = smov [#allocation10]   ;;  %s1362_s18 = smov 128  }
  0x1c   : > { %s293_s15 = sshll.u32 %s1361_s11, 4  ;;  %s1363_s20 = smov 8   ;;  %s294_s15 = int_to_ptr.vmem [resolvable:$true] %s293_s15 }
  0x1d   : > { %1022 = dma.hbm_to_vmem [thread:$0]  (!%p1451_p6), %s292_s14, 4096, %s294_s15, [#allocation9], %s1362_s18, %s1362_s18, %s1363_s20  }
  0x1e   : > { %s961_s21 = sadd.s32 4294967294, %s1354_s30   ;;  %s1471_s23 = sadd.s32 1, %s1354_s30  }
  0x1f   : > { %s34_s24 = ssub.s32 %s1354_s30, %s1471_s23  ;;  %s37_s25 = sadd.s32 1, %s1350_s29 }
  0x20   : > { %p35_p7 = scmp.eq.s32.totalorder %s34_s24, 0  ;;  %p44_p8 = scmp.ne.s32.totalorder %s1350_s29, %s1346_s28 }
  0x21   : > { %p45_p9 = scmp.eq.s32.totalorder %s1354_s30, 0  ;;  %p50_p10 = scmp.ne.s32.totalorder %s1346_s28, %s1342_s27 }
  0x22   : > { %s1482_s22 = scalar_select %p35_p7, %s1350_s29, %s37_s25  }
  0x23   : > { %p1484_p11 = por %p45_p9, %p44_p8  ;;  %p1490_p12 = por %p51_p1, %p50_p10 }
  0x24   : > { %p200_p13 = scmp.eq.s32.totalorder %s1434_s12, 1  ;;  %p206_p0 = scmp.eq.s32.totalorder %s961_s21, 1 }
  0x25   : > { %p1038_p2 = scmp.lt.s32.totalorder %s1354_s30, 2  ;;  %s310_s9 = sand.u32 1, %s1350_s29  }
  0x26   : > { %p1497_p4 = por %p200_p13, %p44_p8  ;;  %p1501_p6 = por %p206_p0, %p50_p10 }
  0x27   : > { %s968_s16 = sshll.u32 %s310_s9, 4  ;;  %s987_s17 = sshll.u32 %s1354_s30, 4 }
  0x28   : > { %s319_s18 = scalar_lea.hbm %s1638_s0, %s987_s17  ;;  %s314_s20 = scalar_lea.vmem [#allocation2], %s968_s16 }
  0x29   : > { %s323_s24 = sshll.u32 %s314_s20, 4  ;;  %s321_s25 = sshll.u32 %s319_s18, 4  ;;  %s324_s24 = int_to_ptr.vmem [resolvable:$true] %s323_s24  ;;  %s322_s25 = int_to_ptr.hbm [resolvable:$true] %s321_s25 }
  0x2a   : > { %p1511_p7 = pnand %p1038_p2, %p1484_p11  ;;  %s311_s1 = scalar_lea.sflag [#allocation3], %s310_s9 }
  0x2b   : > { %s1218_s2 = sshra.s32 %s322_s25, 4  ;;  %s1225_s11 = scalar_lea.hbm %s1638_s0, 32  ;;  %s1219_s2 = int_to_ptr.hbm [resolvable:$true] %s1218_s2 }
  0x2c   : > { %s1220_s4 = scalar_lea.hbm %s1219_s2, 16  ;;  %p1222_p9 = pneg %p1511_p7 }
  0x2d   : > { %p1221_p8 = scmp.ne.s32.totalorder %s1219_s2, %s1220_s4  ;;  %p1226_p11 = scmp.lt.s32.totalorder %s1219_s2, %s1638_s0 }
  0x2e   : > { %p1227_p0 = scmp.lt.s32.totalorder %s1225_s11, %s1220_s4 }
  0x2f   : > { %p1223_p10 = pnand %p1222_p9, %p1221_p8 }
  0x30   : > { %p1228_p2 = por %p1227_p0, %p1226_p11 }
  0x31   : > { %p1224_p13 = pneg %p1223_p10 }
  0x33   : > { %p1229_p5 = pnand %p1228_p2, %p1224_p13 }
  0x35   : > { %1232 = shalt.err (!%p1229_p5)
}
  0x36   : > { %1026 = dma.hbm_to_vmem [thread:$0]  (!%p1511_p7), %s322_s25, 256, %s324_s24, %s311_s1  }
  0x37   : > { %332 = sbr.rel (%p1439_p3) target bundleno = 949 (0x3b5), region = 48  ;;  %s1528_s9 = sand.u32 (!%p1439_p3), 1, %s1346_s28  }
  0x38   : > { %s972_s18 = sshll.u32 (!%p1439_p3), %s1528_s9, 4  ;;  %s335_s20 = scalar_lea.sflag (!%p1439_p3), [#allocation3], %s1528_s9 }
  0x39   : > { %s1532_s16 = scalar_lea.vmem (!%p1439_p3), [#allocation2], %s972_s18 }
  0x3c   : > { %1321 = dma.done.wait (%p1490_p12), %s335_s20, 256  }
  0x3d   : > { %1323 = vsyncadd (%p1490_p12), %s335_s20, 4294967040 }
  0x3e   : > { %1325 = dma.done.wait (%p51_p1), [#allocation6], 8224  }
  0x3f   : > { %1327 = vsyncadd (%p51_p1), [#allocation6], 4294959072 }
  0x40   : > { %1329 = dma.done.wait (%p51_p1), [#allocation9], 4128  }
  0x41   : > { %1331 = vsyncadd (%p51_p1), [#allocation9], 4294963168  ;;  %v430_v0 = vld [vmem:[#allocation5 + $0xf8] sm:$0xff]  ;;  %v428_v1 = vld [vmem:[#allocation5 + $0xe8] sm:$0xff]  ;;  %s1647_s19 = sshll.u32 %s1528_s9, 3  ;;  %s983_s25 = sshll.u32 %s1434_s12, 3 }
  0x42   : > { %v462_v2 = vld [vmem:[#allocation5 + $0x1f8] sm:$0xff]  ;;  %509 = vmatpush.msra.mxu2 %v430_v0  ;;  %v460_v3 = vld [vmem:[#allocation5 + $0x1e8] sm:$0xff]  ;;  %v429_v4 = vld [vmem:[#allocation5 + $0xf0] sm:$0xff]  ;;  %s389_s24 = scalar_lea.vmem [#allocation11], %s1647_s19  ;;  %s801_s11 = scalar_lea.hbm %s1645_s7, %s983_s25 }
  0x43   : > { %529 = vmatpush.msra.mxu3 %v462_v2  ;;  %v426_v5 = vld [vmem:[#allocation5 + $0xd8] sm:$0xff]  ;;  %469 = vmatpush.msra.mxu0 %v429_v4  ;;  %v427_v7 = vld [vmem:[#allocation5 + $0xe0] sm:$0xff]  ;;  %v424_v8 = vld [vmem:[#allocation5 + $0xc8] sm:$0xff]  ;;  %s803_s15 = sshll.u32 %s389_s24, 4  ;;  %s805_s26 = sshll.u32 %s801_s11, 4  ;;  %s804_s15 = int_to_ptr.vmem [resolvable:$true] %s803_s15  ;;  %s806_s26 = int_to_ptr.hbm [resolvable:$true] %s805_s26 }
  0x44   : > { %v458_v6 = vld [vmem:[#allocation5 + $0x1d8] sm:$0xff]  ;;  %510 = vmatpush.msra.mxu2 %v428_v1  ;;  %v461_v9 = vld [vmem:[#allocation5 + $0x1f0] sm:$0xff]  ;;  %v456_v10 = vld [vmem:[#allocation5 + $0x1c8] sm:$0xff]  ;;  %s786_s18 = scalar_lea.sflag [#allocation4], %s1528_s9  ;;  %s1262_s20 = sshra.s32 %s806_s26, 4  ;;  %s1263_s20 = int_to_ptr.hbm [resolvable:$true] %s1262_s20 }
  0x45   : > { %530 = vmatpush.msra.mxu3 %v460_v3  ;;  %470 = vmatpush.msra.mxu0 %v427_v7  ;;  %v425_v11 = vld [vmem:[#allocation5 + $0xd0] sm:$0xff]  ;;  %v459_v12 = vld [vmem:[#allocation5 + $0x1e0] sm:$0xff]  ;;  %v422_v15 = vld [vmem:[#allocation5 + $0xb8] sm:$0xff]  ;;  %s1268_s4 = scalar_lea.hbm %s1645_s7, 16  ;;  %p1269_p12 = scmp.lt.s32.totalorder %s1263_s20, %s1645_s7 }
  0x46   : > { %489 = vmatpush.msra.mxu1 %v461_v9  ;;  %511 = vmatpush.msra.mxu2 %v426_v5  ;;  %v423_v13 = vld [vmem:[#allocation5 + $0xc0] sm:$0xff]  ;;  %v457_v14 = vld [vmem:[#allocation5 + $0x1d0] sm:$0xff]  ;;  %v454_v16 = vld [vmem:[#allocation5 + $0x1b8] sm:$0xff] }
  0x47   : > { %531 = vmatpush.msra.mxu3 %v458_v6  ;;  %471 = vmatpush.msra.mxu0 %v425_v11  ;;  %v421_v17 = vld [vmem:[#allocation5 + $0xb0] sm:$0xff]  ;;  %v455_v18 = vld [vmem:[#allocation5 + $0x1c0] sm:$0xff]  ;;  %v420_v19 = vld [vmem:[#allocation5 + $0xa8] sm:$0xff] }
  0x48   : > { %490 = vmatpush.msra.mxu1 %v459_v12  ;;  %512 = vmatpush.msra.mxu2 %v424_v8  ;;  %v452_v20 = vld [vmem:[#allocation5 + $0x1a8] sm:$0xff]  ;;  %v419_v21 = vld [vmem:[#allocation5 + $0xa0] sm:$0xff]  ;;  %v453_v22 = vld [vmem:[#allocation5 + $0x1b0] sm:$0xff] }
  0x49   : > { %532 = vmatpush.msra.mxu3 %v456_v10  ;;  %472 = vmatpush.msra.mxu0 %v423_v13  ;;  %v418_v23 = vld [vmem:[#allocation5 + $0x98] sm:$0xff]  ;;  %v417_v25 = vld [vmem:[#allocation5 + $0x90] sm:$0xff]  ;;  %v451_v26 = vld [vmem:[#allocation5 + $0x1a0] sm:$0xff] }
  0x4a   : > { %491 = vmatpush.msra.mxu1 %v457_v14  ;;  %513 = vmatpush.msra.mxu2 %v422_v15  ;;  %v450_v24 = vld [vmem:[#allocation5 + $0x198] sm:$0xff]  ;;  %v416_v27 = vld [vmem:[#allocation5 + $0x88] sm:$0xff]  ;;  %v415_v29 = vld [vmem:[#allocation5 + $0x80] sm:$0xff]  ;;  %v1364_v14 = vmov 256.0  }
  0x4b   : > { %533 = vmatpush.msra.mxu3 %v454_v16  ;;  %473 = vmatpush.msra.mxu0 %v421_v17  ;;  %v448_v28 = vld [vmem:[#allocation5 + $0x188] sm:$0xff]  ;;  %v449_v30 = vld [vmem:[#allocation5 + $0x190] sm:$0xff]  ;;  %v414_v31 = vld [vmem:[#allocation5 + $0x78] sm:$0xff]  ;;  %1086 = vrcp.f32 %v1364_v14 }
  0x4c   : > { %492 = vmatpush.msra.mxu1 %v455_v18  ;;  %514 = vmatpush.msra.mxu2 %v420_v19  ;;  %v446_v32 = vld [vmem:[#allocation5 + $0x178] sm:$0xff]  ;;  %v413_v33 = vld [vmem:[#allocation5 + $0x70] sm:$0xff]  ;;  %v447_v34 = vld [vmem:[#allocation5 + $0x180] sm:$0xff] }
  0x4d   : > { %534 = vmatpush.msra.mxu3 %v452_v20  ;;  %474 = vmatpush.msra.mxu0 %v419_v21  ;;  %v412_v35 = vld [vmem:[#allocation5 + $0x68] sm:$0xff]  ;;  %v411_v37 = vld [vmem:[#allocation5 + $0x60] sm:$0xff]  ;;  %v445_v38 = vld [vmem:[#allocation5 + $0x170] sm:$0xff] }
  0x4e   : > { %493 = vmatpush.msra.mxu1 %v453_v22  ;;  %515 = vmatpush.msra.mxu2 %v418_v23  ;;  %v444_v36 = vld [vmem:[#allocation5 + $0x168] sm:$0xff]  ;;  %v410_v39 = vld [vmem:[#allocation5 + $0x58] sm:$0xff]  ;;  %v409_v41 = vld [vmem:[#allocation5 + $0x50] sm:$0xff] }
  0x4f   : > { %535 = vmatpush.msra.mxu3 %v450_v24  ;;  %475 = vmatpush.msra.mxu0 %v417_v25  ;;  %v442_v40 = vld [vmem:[#allocation5 + $0x158] sm:$0xff]  ;;  %v443_v42 = vld [vmem:[#allocation5 + $0x160] sm:$0xff]  ;;  %v408_v43 = vld [vmem:[#allocation5 + $0x48] sm:$0xff] }
  0x50   : > { %494 = vmatpush.msra.mxu1 %v451_v26  ;;  %516 = vmatpush.msra.mxu2 %v416_v27  ;;  %v440_v44 = vld [vmem:[#allocation5 + $0x148] sm:$0xff]  ;;  %v407_v45 = vld [vmem:[#allocation5 + $0x40] sm:$0xff]  ;;  %v441_v46 = vld [vmem:[#allocation5 + $0x150] sm:$0xff] }
  0x51   : > { %536 = vmatpush.msra.mxu3 %v448_v28  ;;  %476 = vmatpush.msra.mxu0 %v415_v29  ;;  %v406_v47 = vld [vmem:[#allocation5 + $0x38] sm:$0xff]  ;;  %v405_v49 = vld [vmem:[#allocation5 + $0x30] sm:$0xff]  ;;  %v439_v50 = vld [vmem:[#allocation5 + $0x140] sm:$0xff]  ;;  %v1087_v15 = vpop.eup %1086 }
  0x52   : > { %495 = vmatpush.msra.mxu1 %v449_v30  ;;  %517 = vmatpush.msra.mxu2 %v414_v31  ;;  %v438_v48 = vld [vmem:[#allocation5 + $0x138] sm:$0xff]  ;;  %v404_v51 = vld [vmem:[#allocation5 + $0x28] sm:$0xff]  ;;  %v403_v53 = vld [vmem:[#allocation5 + $0x20] sm:$0xff]  ;;  %v553_v16 = vmul.f32 256.0, %v1087_v15  ;;  %vm557_vm0 = vweird.f32 %v1087_v15 }
  0x53   : > { %537 = vmatpush.msra.mxu3 %v446_v32  ;;  %477 = vmatpush.msra.mxu0 %v413_v33  ;;  %v436_v52 = vld [vmem:[#allocation5 + $0x128] sm:$0xff]  ;;  %v437_v54 = vld [vmem:[#allocation5 + $0x130] sm:$0xff]  ;;  %v402_v55 = vld [vmem:[#allocation5 + $0x18] sm:$0xff] }
  0x54   : > { %496 = vmatpush.msra.mxu1 %v447_v34  ;;  %518 = vmatpush.msra.mxu2 %v412_v35  ;;  %v434_v56 = vld [vmem:[#allocation5 + $0x118] sm:$0xff]  ;;  %v401_v57 = vld [vmem:[#allocation5 + $0x10] sm:$0xff]  ;;  %v435_v58 = vld [vmem:[#allocation5 + $0x120] sm:$0xff]  ;;  %v554_v17 = vsub.f32 1.0, %v553_v16 }
  0x55   : > { %538 = vmatpush.msra.mxu3 %v444_v36  ;;  %478 = vmatpush.msra.mxu0 %v411_v37  ;;  %v400_v59 = vld [vmem:[#allocation5 + $0x8] sm:$0xff]  ;;  %v397_v61 = vld [vmem:[%s1532_s16] sm:$0xff] }
  0x56   : > { %497 = vmatpush.msra.mxu1 %v445_v38  ;;  %519 = vmatpush.msra.mxu2 %v410_v39  ;;  %v432_v60 = vld [vmem:[#allocation5 + $0x108] sm:$0xff]  ;;  %v399_v63 = vld [vmem:[#allocation5] sm:$0xff]  ;;  %v433_v0 = vld [vmem:[#allocation5 + $0x110] sm:$0xff]  ;;  %v555_v18 = vmul.f32 %v1087_v15, %v554_v17 }
  0x57   : > { %539 = vmatpush.msra.mxu3 %v442_v40  ;;  %479 = vmatpush.msra.mxu0 %v409_v41  ;;  %v398_v62 = vld [vmem:[%s1532_s16 + $0x8] sm:$0xff]  ;;  %v431_v1 = vld [vmem:[#allocation5 + $0x100] sm:$0xff]  ;;  %s1264_s16 = scalar_lea.hbm %s1263_s20, 8 }
  0x58   : > { %498 = vmatpush.msra.mxu1 %v443_v42  ;;  %520 = vmatpush.msra.mxu2 %v408_v43  ;;  %v463_v2 = vld [vmem:[#allocation7] sm:$0x3]  ;;  %v556_v19 = vadd.f32 %v1087_v15, %v555_v18  ;;  %v699_v30 = vld [vmem:[#allocation10 + $0x70] sm:$0xff]  ;;  %v698_v32 = vld [vmem:[#allocation10 + $0x68] sm:$0xff]  ;;  %p1265_p1 = scmp.ne.s32.totalorder %s1263_s20, %s1264_s16  ;;  %p1270_p7 = scmp.lt.s32.totalorder %s1268_s4, %s1264_s16 }
  0x59   : > { %540 = vmatpush.msra.mxu3 %v440_v44  ;;  %480 = vmatpush.msra.mxu0 %v407_v45  ;;  %v465_v3 = vperm.slane %v463_v2, 0  ;;  %v466_v6 = vperm.slane %v463_v2, 1  ;;  %v700_v28 = vld [vmem:[#allocation10 + $0x78] sm:$0xff]  ;;  %v715_v31 = vld [vmem:[#allocation10 + $0xf0] sm:$0xff]  ;;  %v714_v33 = vld [vmem:[#allocation10 + $0xe8] sm:$0xff] }
  0x5a   : > { %499 = vmatpush.msra.mxu1 %v441_v46  ;;  %521 = vmatpush.msra.mxu2 %v406_v47  ;;  %v558_v20 = vsel %vm557_vm0, %v1087_v15, %v556_v19  ;;  %v716_v29 = vld [vmem:[#allocation10 + $0xf8] sm:$0xff]  ;;  %v697_v34 = vld [vmem:[#allocation10 + $0x60] sm:$0xff]  ;;  %v695_v38 = vld [vmem:[#allocation10 + $0x50] sm:$0xff]  ;;  %p1266_p3 = pnand %p1265_p1, %p1497_p4  ;;  %p1271_p8 = por %p1270_p7, %p1269_p12 }
  0x5b   : > { %541 = vmatpush.msra.mxu3 %v438_v48  ;;  %481 = vmatpush.msra.mxu0 %v405_v49  ;;  %v713_v35 = vld [vmem:[#allocation10 + $0xe0] sm:$0xff]  ;;  %v696_v36 = vld [vmem:[#allocation10 + $0x58] sm:$0xff]  ;;  %v711_v39 = vld [vmem:[#allocation10 + $0xd0] sm:$0xff] }
  0x5c   : > { %500 = vmatpush.msra.mxu1 %v439_v50  ;;  %522 = vmatpush.msra.mxu2 %v404_v51  ;;  %v712_v37 = vld [vmem:[#allocation10 + $0xd8] sm:$0xff]  ;;  %v694_v42 = vld [vmem:[#allocation10 + $0x48] sm:$0xff]  ;;  %v693_v45 = vld [vmem:[#allocation10 + $0x40] sm:$0xff]  ;;  %p1267_p5 = pneg %p1266_p3 }
  0x5d   : > { %542 = vmatpush.msra.mxu3 %v436_v52  ;;  %482 = vmatpush.msra.mxu0 %v403_v53  ;;  %v710_v43 = vld [vmem:[#allocation10 + $0xc8] sm:$0xff]  ;;  %v709_v46 = vld [vmem:[#allocation10 + $0xc0] sm:$0xff]  ;;  %v692_v47 = vld [vmem:[#allocation10 + $0x38] sm:$0xff] }
  0x5e   : > { %501 = vmatpush.msra.mxu1 %v437_v54  ;;  %523 = vmatpush.msra.mxu2 %v402_v55  ;;  %v708_v48 = vld [vmem:[#allocation10 + $0xb8] sm:$0xff]  ;;  %v691_v49 = vld [vmem:[#allocation10 + $0x30] sm:$0xff]  ;;  %v690_v51 = vld [vmem:[#allocation10 + $0x28] sm:$0xff]  ;;  %p1272_p9 = pnand %p1271_p8, %p1267_p5 }
  0x5f   : > { %543 = vmatpush.msra.mxu3 %v434_v56  ;;  %483 = vmatpush.msra.mxu0 %v401_v57  ;;  %v707_v50 = vld [vmem:[#allocation10 + $0xb0] sm:$0xff]  ;;  %v706_v52 = vld [vmem:[#allocation10 + $0xa8] sm:$0xff]  ;;  %v689_v54 = vld [vmem:[#allocation10 + $0x20] sm:$0xff] }
  0x60   : > { %502 = vmatpush.msra.mxu1 %v435_v58  ;;  %524 = vmatpush.msra.mxu2 %v400_v59  ;;  %v705_v55 = vld [vmem:[#allocation10 + $0xa0] sm:$0xff]  ;;  %v688_v57 = vld [vmem:[#allocation10 + $0x18] sm:$0xff] }
  0x61   : > { %544 = vmatpush.msra.mxu3 %v432_v60  ;;  %525 = vmatmul.f32.vlgmr.msra.gmra.mxu2 %v397_v61  ;;  %v704_v58 = vld [vmem:[#allocation10 + $0x98] sm:$0xff]  ;;  %v687_v60 = vld [vmem:[#allocation10 + $0x10] sm:$0xff] }
  0x62   : > { %545 = vmatmul.f32.vlgmr.msra.gmra.mxu3 %v398_v62  ;;  %484 = vmatpush.msra.mxu0 %v399_v63  ;;  %v686_v63 = vld [vmem:[#allocation10 + $0x8] sm:$0xff]  ;;  %v581_v2 = vld [vmem:[%s1641_s3] sm:$0x3] }
  0x63   : > { %503 = vmatpush.msra.mxu1 %v433_v0  ;;  %485 = vmatmul.f32.vlgmr.msra.gmra.mxu0 %v397_v61  ;;  %v703_v61 = vld [vmem:[#allocation10 + $0x90] sm:$0xff]  ;;  %v702_v0 = vld [vmem:[#allocation10 + $0x88] sm:$0xff] }
  0x64   : > { %721 = vmatpush.msrb.mxu0 %v700_v28 }
  0x65   : > { %504 = vmatpush.msra.mxu1 %v431_v1 }
  0x66   : > { %505 = vmatmul.f32.vlgmr.msra.gmra.mxu1 %v398_v62  ;;  %722 = vmatpush.msrb.mxu0 %v699_v30 }
  0x67   : > { %741 = vmatpush.msrb.mxu1 %v716_v29 }
  0x68   : > { %723 = vmatpush.msrb.mxu0 %v698_v32 }
  0x69   : > { %742 = vmatpush.msrb.mxu1 %v715_v31 }
  0x6a   : > { %724 = vmatpush.msrb.mxu0 %v697_v34 }
  0x6b   : > { %743 = vmatpush.msrb.mxu1 %v714_v33 }
  0x6c   : > { %725 = vmatpush.msrb.mxu0 %v696_v36 }
  0x6d   : > { %744 = vmatpush.msrb.mxu1 %v713_v35 }
  0x6e   : > { %726 = vmatpush.msrb.mxu0 %v695_v38 }
  0x6f   : > { %745 = vmatpush.msrb.mxu1 %v712_v37 }
  0x70   : > { %727 = vmatpush.msrb.mxu0 %v694_v42 }
  0x71   : > { %746 = vmatpush.msrb.mxu1 %v711_v39 }
  0x72   : > { %728 = vmatpush.msrb.mxu0 %v693_v45 }
  0x73   : > { %747 = vmatpush.msrb.mxu1 %v710_v43 }
  0x74   : > { %729 = vmatpush.msrb.mxu0 %v692_v47 }
  0x75   : > { %748 = vmatpush.msrb.mxu1 %v709_v46 }
  0x76   : > { %730 = vmatpush.msrb.mxu0 %v691_v49 }
  0x77   : > { %749 = vmatpush.msrb.mxu1 %v708_v48 }
  0x78   : > { %731 = vmatpush.msrb.mxu0 %v690_v51 }
  0x79   : > { %750 = vmatpush.msrb.mxu1 %v707_v50 }
  0x7a   : > { %732 = vmatpush.msrb.mxu0 %v689_v54 }
  0x7b   : > { %751 = vmatpush.msrb.mxu1 %v706_v52 }
  0x7c   : > { %733 = vmatpush.msrb.mxu0 %v688_v57 }
  0x7d   : > { %752 = vmatpush.msrb.mxu1 %v705_v55 }
  0x7e   : > { %734 = vmatpush.msrb.mxu0 %v687_v60 }
  0x7f   : > { %753 = vmatpush.msrb.mxu1 %v704_v58 }
  0x80   : > { %735 = vmatpush.msrb.mxu0 %v686_v63 }
  0x81   : > { %754 = vmatpush.msrb.mxu1 %v703_v61 }
  0x83   : > { %755 = vmatpush.msrb.mxu1 %v702_v0 }
  0xe0   : > { %v486_v4 = vpop.f32.mrf.mxu0 }
  0xe1   : > { %v487_v5 = vadd.f32 %v486_v4, %v465_v3  ;;  %v685_v3 = vld [vmem:[#allocation10] sm:$0xff] }
  0xe2   : > { %v701_v4 = vld [vmem:[#allocation10 + $0x80] sm:$0xff]  ;;  %736 = vmatpush.msrb.mxu0 %v685_v3 }
  0xe3   : > { %v506_v7 = vpop.f32.mrf.mxu1  ;;  %756 = vmatpush.msrb.mxu1 %v701_v4 }
  0xe4   : > { %v526_v8 = vpop.f32.mrf.mxu2  ;;  %v507_v11 = vadd.f32 %v506_v7, %v487_v5  ;;  %v583_v7 = vperm.slane %v581_v2, 0 }
  0xe5   : > { %v546_v9 = vpop.f32.mrf.mxu3  ;;  %v527_v10 = vadd.f32 %v526_v8, %v466_v6  ;;  %v589_v6 = vld [vmem:[#allocation8] sm:$0x3]  ;;  %v584_v8 = vperm.slane %v581_v2, 1 }
  0xe7   : > { %v547_v12 = vadd.f32 %v546_v9, %v527_v10 }
  0xe9   : > { %v549_v13 = vadd.f32 %v547_v12, %v507_v11 }
  0xeb   : > { %550 = vadd.xlane.f32.xlu0 %v549_v13  ;;  %v592_v13 = vperm.slane %v589_v6, 1 }
 0x15e   : > { %v551_v21 = vpop.xlane.xlu0 %550 }
 0x15f   : > { %v559_v22 = vmul.f32 %v558_v20, %v551_v21 }
 0x161   : > { %v1548_v23 = vsub.f32 %v507_v11, %v559_v22  ;;  %v1550_v24 = vsub.f32 %v547_v12, %v559_v22  ;;  %v591_v12 = vperm.slane %v589_v6, 0 }
 0x163   : > { %v562_v25 = vmul.f32 %v1548_v23, %v1548_v23  ;;  %v563_v26 = vmul.f32 %v1550_v24, %v1550_v24 }
 0x165   : > { %v564_v27 = vadd.f32 %v563_v26, %v562_v25 }
 0x167   : > { %565 = vadd.xlane.f32.xlu0 %v564_v27 }
 0x1da   : > { %v566_v40 = vpop.xlane.xlu0 %565 }
 0x1db   : > { %v567_v41 = vmul.f32 %v566_v40, %v558_v20 }
 0x1dd   : > { %v568_v44 = vadd.f32 1e-05, %v567_v41 }
 0x1df   : > { %1088 = vrsqrt.f32 %v568_v44  ;;  %vm575_vm2 = vweird.f32 %v568_v44 }
 0x1e5   : > { %v1089_v53 = vpop.eup %1088 }
 0x1e6   : > { %v570_v56 = vmul.f32 %v1089_v53, %v568_v44  ;;  %vm576_vm1 = vweird.f32 %v1089_v53 }
 0x1e7   : > { %vm577_vm3 = vmor %vm575_vm2, %vm576_vm1 }
 0x1e8   : > { %v571_v59 = vmul.f32 %v1089_v53, %v570_v56 }
 0x1ea   : > { %v572_v62 = vmul.f32 0.5, %v571_v59 }
 0x1ec   : > { %v573_v1 = vsub.f32 1.5, %v572_v62 }
 0x1ee   : > { %v574_v5 = vmul.f32 %v1089_v53, %v573_v1 }
 0x1f0   : > { %v578_v9 = vsel %vm577_vm3, %v1089_v53, %v574_v5 }
 0x1f1   : > { %v579_v10 = vmul.f32 %v578_v9, %v1548_v23  ;;  %v580_v11 = vmul.f32 %v578_v9, %v1550_v24 }
 0x1f3   : > { %v587_v14 = vmul.f32 %v583_v7, %v579_v10  ;;  %v588_v15 = vmul.f32 %v584_v8, %v580_v11 }
 0x1f5   : > { %v1561_v16 = vadd.f32 %v591_v12, %v587_v14  ;;  %v1563_v17 = vadd.f32 %v592_v13, %v588_v15 }
 0x1f7   : > { %v1566_v18 = vmul.f32 0.70710677, %v1561_v16  ;;  %v1569_v19 = vmul.f32 0.70710677, %v1563_v17 }
 0x1f9   : > { %v601_v20 = vmul.f32 %v1566_v18, %v1566_v18  ;;  %v641_v21 = vmul.f32 %v1569_v19, %v1569_v19 }
 0x1fb   : > { %v602_v22 = vmin.f32 %v601_v20, 16.0  ;;  %v642_v23 = vmin.f32 %v641_v21, 16.0 }
 0x1fd   : > { %v603_v24 = vmul.f32 2.1237322e-06, %v602_v22  ;;  %v614_v25 = vmul.f32 3.8918573e-05, %v602_v22  ;;  %v643_v26 = vmul.f32 2.1237322e-06, %v642_v23 }
 0x1fe   : > { %v654_v27 = vmul.f32 3.8918573e-05, %v642_v23 }
 0x1ff   : > { %v604_v28 = vadd.f32 0.00028619796, %v603_v24  ;;  %v615_v29 = vadd.f32 0.001143296, %v614_v25  ;;  %v644_v30 = vadd.f32 0.00028619796, %v643_v26 }
 0x200   : > { %v655_v31 = vadd.f32 0.001143296, %v654_v27 }
 0x201   : > { %v605_v32 = vmul.f32 %v604_v28, %v602_v22  ;;  %v616_v33 = vmul.f32 %v615_v29, %v602_v22  ;;  %v645_v34 = vmul.f32 %v644_v30, %v642_v23  ;;  %v597_v30 = vmul.f32 0.5, %v1561_v16 }
 0x202   : > { %v656_v35 = vmul.f32 %v655_v31, %v642_v23 }
 0x203   : > { %v606_v36 = vadd.f32 0.0036580483, %v605_v32  ;;  %v617_v37 = vadd.f32 0.014752088, %v616_v33  ;;  %v646_v40 = vadd.f32 0.0036580483, %v645_v34 }
 0x204   : > { %v657_v38 = vadd.f32 0.014752088, %v656_v35 }
 0x205   : > { %v618_v39 = vmul.f32 %v617_v37, %v602_v22  ;;  %v607_v42 = vmul.f32 %v606_v36, %v602_v22  ;;  %v647_v46 = vmul.f32 %v646_v40, %v642_v23 }
 0x206   : > { %v658_v41 = vmul.f32 %v657_v38, %v642_v23 }
 0x207   : > { %v619_v43 = vadd.f32 0.112945676, %v618_v39  ;;  %v608_v48 = vadd.f32 0.05243302, %v607_v42  ;;  %v648_v52 = vadd.f32 0.05243302, %v647_v46 }
 0x208   : > { %v659_v44 = vadd.f32 0.112945676, %v658_v41 }
 0x209   : > { %v620_v45 = vmul.f32 %v619_v43, %v602_v22  ;;  %v609_v54 = vmul.f32 %v608_v48, %v602_v22  ;;  %v649_v57 = vmul.f32 %v648_v52, %v642_v23 }
 0x20a   : > { %v660_v47 = vmul.f32 %v659_v44, %v642_v23 }
 0x20b   : > { %v621_v49 = vadd.f32 0.4994258, %v620_v45  ;;  %v610_v58 = vadd.f32 0.18741608, %v609_v54  ;;  %v650_v59 = vadd.f32 0.18741608, %v649_v57 }
 0x20c   : > { %v661_v50 = vadd.f32 0.4994258, %v660_v47 }
 0x20d   : > { %v622_v51 = vmul.f32 %v621_v49, %v602_v22  ;;  %v611_v61 = vmul.f32 %v610_v58, %v602_v22  ;;  %v651_v0 = vmul.f32 %v650_v59, %v642_v23 }
 0x20e   : > { %v662_v53 = vmul.f32 %v661_v50, %v642_v23 }
 0x20f   : > { %v623_v55 = vadd.f32 1.0, %v622_v51  ;;  %v612_v3 = vadd.f32 1.1283791, %v611_v61  ;;  %v652_v9 = vadd.f32 1.1283791, %v651_v0 }
 0x210   : > { %v663_v56 = vadd.f32 1.0, %v662_v53 }
 0x211   : > { %1090 = vrcp.f32 %v623_v55  ;;  %v635_v4 = vand.u32 2147483648, %v623_v55  ;;  %v633_v7 = vand.u32 2147483647, %v623_v55  ;;  %vm629_vm6 = vweird.f32 %v623_v55 }
 0x212   : > { %1092 = vrcp.f32 %v663_v56  ;;  %v675_v8 = vand.u32 2147483648, %v663_v56  ;;  %v673_v11 = vand.u32 2147483647, %v663_v56  ;;  %vm669_vm8 = vweird.f32 %v663_v56 }
 0x213   : > { %v636_v13 = vor.u32 1.1754944e-38, %v635_v4  ;;  %v613_v15 = vmul.f32 %v612_v3, %v1566_v18  ;;  %vm634_vm9 = vcmp.eq.f32.partialorder %v633_v7, 8.507059e+37  ;;  %v653_v23 = vmul.f32 %v652_v9, %v1569_v19  ;;  %v1085_v19 = vld [vmem:[%s1644_s6] ss:$0 sm:$0xff] }
 0x214   : > { %v676_v21 = vor.u32 1.1754944e-38, %v675_v8  ;;  %vm674_vm11 = vcmp.eq.f32.partialorder %v673_v11, 8.507059e+37  ;;  %v598_v18 = vmul.f32 0.5, %v1563_v17 }
 0x217   : > { %v1091_v60 = vpop.eup %1090 }
 0x218   : > { %v1093_v62 = vpop.eup %1092  ;;  %v625_v63 = vmul.f32 %v1091_v60, %v623_v55  ;;  %vm630_vm4 = vweird.f32 %v1091_v60 }
 0x219   : > { %v665_v1 = vmul.f32 %v1093_v62, %v663_v56  ;;  %vm670_vm5 = vweird.f32 %v1093_v62  ;;  %vm631_vm7 = vmor %vm629_vm6, %vm630_vm4 }
 0x21a   : > { %v626_v2 = vsub.f32 1.0, %v625_v63  ;;  %vm671_vm10 = vmor %vm669_vm8, %vm670_vm5 }
 0x21b   : > { %v666_v5 = vsub.f32 1.0, %v665_v1 }
 0x21c   : > { %v627_v6 = vmul.f32 %v1091_v60, %v626_v2 }
 0x21d   : > { %v667_v10 = vmul.f32 %v1093_v62, %v666_v5 }
 0x21e   : > { %v628_v12 = vadd.f32 %v1091_v60, %v627_v6 }
 0x21f   : > { %v668_v14 = vadd.f32 %v1093_v62, %v667_v10 }
 0x220   : > { %v632_v20 = vsel %vm631_vm7, %v1091_v60, %v628_v12 }
 0x221   : > { %v637_v22 = vsel %vm634_vm9, %v636_v13, %v632_v20  ;;  %v672_v24 = vsel %vm671_vm10, %v1093_v62, %v668_v14 }
 0x222   : > { %v638_v25 = vmul.f32 %v637_v22, %v613_v15  ;;  %v677_v26 = vsel %vm674_vm11, %v676_v21, %v672_v24 }
 0x223   : > { %v678_v27 = vmul.f32 %v677_v26, %v653_v23 }
 0x224   : > { %v979_v28 = vclamps-f32 %v638_v25, 1.0 }
 0x225   : > { %v980_v29 = vclamps-f32 %v678_v27, 1.0 }
 0x226   : > { %v681_v31 = vadd.f32 1.0, %v979_v28 }
 0x227   : > { %v682_v32 = vadd.f32 1.0, %v980_v29 }
 0x228   : > { %v683_v33 = vmul.f32 %v681_v31, %v597_v30 }
 0x229   : > { %v684_v34 = vmul.f32 %v682_v32, %v598_v18 }
 0x22a   : > { %737 = vmatmul.f32.vlgmr.msrb.gmra.mxu0 %v683_v33 }
 0x22b   : > { %757 = vmatmul.f32.vlgmr.msrb.gmra.mxu1 %v684_v34 }
 0x2a7   : > { %v738_v35 = vpop.f32.mrf.mxu0 }
 0x2a8   : > { %v739_v36 = vadd.f32 %v1085_v19, %v738_v35  ;;  %v758_v37 = vpop.f32.mrf.mxu1 }
 0x2aa   : > { %v759_v38 = vadd.f32 %v758_v37, %v739_v36 }
 0x2ac   : > { %761 = vst [vmem:[%s389_s24] sm:$0xff] %v759_v38  ;;  %762 = vmax.xlane.f32.xlu1 %v759_v38 }
 0x31f   : > { %v763_v16 = vpop.xlane.xlu1 %762 }
 0x320   : > { %v764_v17 = vsub.f32 %v759_v38, %v763_v16 }
 0x322   : > { %v765_v39 = vmul.f32 1.442695, %v764_v17 }
 0x324   : > { %1094 = vpow2.f32 %v765_v39 }
 0x32a   : > { %v1095_v40 = vpop.eup %1094 }
 0x32b   : > { %767 = vadd.xlane.f32.xlu1 %v1095_v40 }
 0x32c   : > { %1275 = shalt.err (!%p1272_p9)
}
 0x32d   : > { %1006 = dma.vmem_to_hbm [thread:$0]  (%p1497_p4), %s804_s15, 128, %s806_s26, %s786_s18  }
 0x32e   : > { %s815_s21 = scalar_lea.hbm %s1646_s8, %s983_s25  ;;  %s1661_s17 = sshll.u32 %s1528_s9, 3 }
 0x32f   : > { %s396_s11 = scalar_lea.vmem [#allocation12], %s1661_s17  ;;  %s819_s26 = sshll.u32 %s815_s21, 4  ;;  %s820_s26 = int_to_ptr.hbm [resolvable:$true] %s819_s26 }
 0x330   : > { %s817_s15 = sshll.u32 %s396_s11, 4  ;;  %s791_s12 = scalar_lea.sflag [#allocation13], %s1528_s9  ;;  %s818_s15 = int_to_ptr.vmem [resolvable:$true] %s817_s15 }
 0x331   : > { %s1290_s18 = sshra.s32 %s820_s26, 4  ;;  %s1296_s1 = scalar_lea.hbm %s1646_s8, 16  ;;  %s1291_s18 = int_to_ptr.hbm [resolvable:$true] %s1290_s18 }
 0x332   : > { %s1292_s25 = scalar_lea.hbm %s1291_s18, 8  ;;  %p1297_p0 = scmp.lt.s32.totalorder %s1291_s18, %s1646_s8 }
 0x333   : > { %p1293_p10 = scmp.ne.s32.totalorder %s1291_s18, %s1292_s25  ;;  %p1298_p2 = scmp.lt.s32.totalorder %s1296_s1, %s1292_s25 }
 0x335   : > { %p1294_p13 = pnand %p1293_p10, %p1497_p4  ;;  %p1299_p1 = por %p1298_p2, %p1297_p0 }
 0x337   : > { %p1295_p11 = pneg %p1294_p13 }
 0x339   : > { %p1300_p3 = pnand %p1299_p1, %p1295_p11 }
 0x39e   : > { %v768_v41 = vpop.xlane.xlu1 %767 }
 0x39f   : > { %1096 = vrcp.f32 %v768_v41  ;;  %v780_v45 = vand.u32 2147483648, %v768_v41  ;;  %v778_v47 = vand.u32 2147483647, %v768_v41  ;;  %vm774_vm13 = vweird.f32 %v768_v41 }
 0x3a1   : > { %v781_v49 = vor.u32 1.1754944e-38, %v780_v45  ;;  %vm779_vm15 = vcmp.eq.f32.partialorder %v778_v47, 8.507059e+37 }
 0x3a5   : > { %v1097_v42 = vpop.eup %1096 }
 0x3a6   : > { %v770_v43 = vmul.f32 %v1097_v42, %v768_v41  ;;  %vm775_vm12 = vweird.f32 %v1097_v42 }
 0x3a7   : > { %vm776_vm14 = vmor %vm774_vm13, %vm775_vm12 }
 0x3a8   : > { %v771_v44 = vsub.f32 1.0, %v770_v43 }
 0x3aa   : > { %v772_v46 = vmul.f32 %v1097_v42, %v771_v44 }
 0x3ac   : > { %v773_v48 = vadd.f32 %v1097_v42, %v772_v46 }
 0x3ae   : > { %v777_v50 = vsel %vm776_vm14, %v1097_v42, %v773_v48 }
 0x3af   : > { %v782_v51 = vsel %vm779_vm15, %v781_v49, %v777_v50 }
 0x3b0   : > { %v783_v52 = vmul.f32 %v1095_v40, %v782_v51 }
 0x3b2   : > { %784 = vst [vmem:[%s396_s11] sm:$0xff] %v783_v52 }
 0x3b3   : > { %1303 = shalt.err (!%p1300_p3)
}
 0x3b4   : > { %1007 = dma.vmem_to_hbm [thread:$0]  (%p1497_p4), %s818_s15, 128, %s820_s26, %s791_s12  }
 0x3b5 PF: > { %s831_s9 = sand.u32 1, %s1342_s27   ;;  %p1662_p5 = scmp.ge.s32.totalorder %s1354_s30, 2 }
 0x3b6   : > { %s832_s13 = scalar_lea.sflag [#allocation4], %s831_s9 }
 0x3b7   : > { %p1028_p12 = pnand %p1662_p5, %p1501_p6 }
 0x3b9   : > { %p1029_p7 = pneg %p1028_p12 }
 0x3bb   : > { %1333 = dma.done.wait (%p1029_p7), %s832_s13, 128  }
 0x3bc   : > { %1335 = vsyncadd (%p1029_p7), %s832_s13, 4294967168  ;;  %s842_s19 = scalar_lea.sflag [#allocation13], %s831_s9 }
 0x3bd   : > { %1337 = dma.done.wait (%p1029_p7), %s842_s19, 128  }
 0x3be   : > { %1339 = vsyncadd (%p1029_p7), %s842_s19, 4294967168  ;;  %p27_p4 = scmp.ge.s32.totalorder %s1471_s23, 4   ;;  %s1663_s27 = smov %s1346_s28 }
 0x3bf   : > { %s1664_s28 = smov %s1350_s29  ;;  %s1665_s29 = smov %s1482_s22 }
 0x3c0   : > { %s1666_s30 = smov %s1471_s23  ;;  %29 = sbr.rel (!%p27_p4) target bundleno = 13 (0xd), region = 126 }
 0x3c5   :  { %848 = vsyncpa [#allocation3], 1 }
 0x3c6   :  { %850 = vsyncpa [#allocation3 + $0x1], 1 }
 0x3c7   :  { %851 = vsyncpa [#allocation6], 1 }
 0x3c8   :  { %852 = vsyncpa [#allocation9], 1 }
 0x3c9   :  { %853 = vsyncpa [#allocation4], 1 }
 0x3ca   :  { %855 = vsyncpa [#allocation4 + $0x1], 1 }
 0x3cb   :  { %856 = vsyncpa [#allocation13], 1 }
 0x3cc   :  { %858 = vsyncpa [#allocation13 + $0x1], 1 }

</bundles_post_ra>
